<compile_context>
chip_gen: v6e
topology: v6e:2x2x1
jax: 0.10.0
libtpu: 0.0.40
codegen_flags: <defaults>
</compile_context>

<pallas_src>
import functools

import jax
import jax.numpy as jnp
from jax.experimental import pallas as pl
from jax.experimental.pallas import tpu as pltpu

_LANE = 128       # lane width (last-dim tiling)
_BF16_SUBLANE = 16  # bf16 sublane packing (second-to-last dim)


def _round_up(n, m):
    return ((n + m - 1) // m) * m


# ---------------------------------------------------------------------------
# Kernel
# ---------------------------------------------------------------------------
def _fused_mlp_kernel(*refs, num_layers):
    # refs = (x_ref, w0, b0, w1, b1, ..., w_{L-1}, b_{L-1}, o_ref)
    x_ref = refs[0]
    o_ref = refs[1 + 2 * num_layers]

    h = x_ref[...].astype(jnp.bfloat16)          # in-kernel bf16 cast (no wrapper pad/cast)
    for layer in range(num_layers):
        w_ref = refs[1 + 2 * layer]              # bf16 (Din[_pad], Dout_pad), pre-transposed
        b_ref = refs[2 + 2 * layer]              # f32  (1, Dout_pad)
        # MXU matmul: bf16 x bf16 -> f32 accumulate. No in-kernel transpose.
        y = jnp.dot(h, w_ref[...], preferred_element_type=jnp.float32)
        y = y + b_ref[...]                       # f32 bias epilogue
        if layer < num_layers - 1:
            h = jnp.maximum(y, 0.0).astype(jnp.bfloat16)   # ReLU, bf16 for next MXU op
        else:
            h = y                                # final layer: no ReLU
    o_ref[...] = h.astype(o_ref.dtype)
    # TODO(synk): for the small-batch / large-weight regime, switch weights to
    # memory_space=pl.ANY and overlap layer l+1's weight DMA with layer l's matmul
    # via double-buffered pltpu.make_async_copy (not needed at these sizes).


# ---------------------------------------------------------------------------
# One-time parameter packing (hoisted out of the per-call hot path)
# ---------------------------------------------------------------------------
def pack_params(params):
    """params: list of (w, b) in PyTorch nn.Linear layout (w: (out, in), b: (out,)).

    Returns packed weights transposed to (in, out), output dims zero-padded to a
    multiple of 128, weights cast to bf16, biases as (1, out_pad) f32.  Call ONCE
    and reuse the result for every forward call."""
    dims = [int(params[0][0].shape[1])] + [int(w.shape[0]) for (w, _) in params]
    # Input feature dim stays unpadded (the kernel takes a full-extent feature block);
    # all layer OUTPUT dims are padded to lane-dense multiples of 128.
    pdims = [dims[0]] + [_round_up(d, _LANE) for d in dims[1:]]

    weights, biases = [], []
    for layer, (w, b) in enumerate(params):
        din, dout = dims[layer], dims[layer + 1]
        pin, pout = pdims[layer], pdims[layer + 1]
        wt = jnp.asarray(w, jnp.float32).T.astype(jnp.bfloat16)        # (din, dout)
        wt = jnp.pad(wt, ((0, pin - din), (0, pout - dout)))           # (pin, pout)
        b2 = jnp.pad(jnp.asarray(b, jnp.float32), (0, pout - dout)).reshape(1, pout)
        weights.append(wt)
        biases.append(b2)
    return {"weights": weights, "biases": biases, "dims": tuple(dims), "pdims": tuple(pdims)}


# ---------------------------------------------------------------------------
# Batch tiling: bf16-friendly (multiple of 16) tiles, bounded padding waste.
# ---------------------------------------------------------------------------
def _choose_batch_tiling(batch, max_tile=256, min_tiles=1):
    n_tiles = max(min_tiles, -(-batch // max_tile))      # ceil(batch / max_tile)
    if n_tiles <= 1:
        return batch, batch, 1                            # full-batch block, no padding
    tb = _round_up(-(-batch // n_tiles), _BF16_SUBLANE)   # bounded padding, 16-aligned
    n_tiles = -(-batch // tb)
    return tb, tb * n_tiles, n_tiles


def _const_block_spec(shape, single_buffer):
    index_map = lambda i: (0,) * len(shape)
    if single_buffer:
        # Constant block index -> no pipelining needed; single buffer halves VMEM use.
        return pl.BlockSpec(shape, index_map, pipeline_mode=pl.Buffered(1))
    return pl.BlockSpec(shape, index_map)


# ---------------------------------------------------------------------------
# Forward pass
# ---------------------------------------------------------------------------
def dnn_forward(packed, x, *, out_dtype=jnp.float32, max_batch_tile=256, min_batch_tiles=1):
    """Fused MLP forward.  `packed` = pack_params(params).  x: (batch, in_dim).

    out_dtype=jnp.bfloat16 halves output HBM writeback if the consumer tolerates it.
    min_batch_tiles=2 can be used on v7x for compute-bound large batches so both
    TensorCores get a grid tile."""
    weights, biases = packed["weights"], packed["biases"]
    dims, pdims = packed["dims"], packed["pdims"]
    num_layers = len(weights)

    batch, in_dim = x.shape
    assert in_dim == dims[0], (in_dim, dims[0])
    out_dim = dims[-1]

    tb, pbatch, n_tiles = _choose_batch_tiling(batch, max_batch_tile, min_batch_tiles)
    x_in = x if pbatch == batch else jnp.pad(x, ((0, pbatch - batch), (0, 0)))

    wb_flat = []
    for w, b in zip(weights, biases):
        wb_flat += [w, b]

    # --- VMEM budget check (single-buffered consts; IO tiles double-buffered) -------
    weight_bytes = sum(int(a.size) * a.dtype.itemsize for a in wb_flat)
    io_bytes = 2 * tb * in_dim * x.dtype.itemsize + 2 * tb * pdims[-1] * jnp.dtype(out_dtype).itemsize
    act_bytes = 2 * tb * max(pdims) * 4
    vmem_est = weight_bytes + io_bytes + act_bytes
    if vmem_est > 48 * 1024 * 1024:
        # TODO(synk): fall back to a tiled / per-layer-streaming path (pl.ANY weights +
        # double-buffered make_async_copy, 256-wide N/K tiles on v6e/v7x, 128 on v5e)
        # for weight sets that do not fit v7x's 64 MiB VMEM.
        raise NotImplementedError(
            f"All-weights-resident fused MLP needs ~{vmem_est >> 20} MiB VMEM; "
            "exceeds the safe resident budget (v7x has 64 MiB).")

    compiler_kwargs = {"dimension_semantics": ("parallel",)}
    if vmem_est > 12 * 1024 * 1024:
        # Raise the scoped-VMEM limit (v5e default is 16 MiB, v6e/v7x 32 MiB).
        compiler_kwargs["vmem_limit_bytes"] = min(2 * vmem_est + (8 << 20), 100 * 1024 * 1024)

    def build(single_buffer_consts):
        in_specs = [pl.BlockSpec((tb, in_dim), lambda i: (i, 0))]   # unpadded feature dim
        for layer in range(num_layers):
            pin, pout = pdims[layer], pdims[layer + 1]
            in_specs.append(_const_block_spec((pin, pout), single_buffer_consts))
            in_specs.append(_const_block_spec((1, pout), single_buffer_consts))
        return pl.pallas_call(
            functools.partial(_fused_mlp_kernel, num_layers=num_layers),
            out_shape=jax.ShapeDtypeStruct((pbatch, pdims[-1]), out_dtype),
            grid=(n_tiles,),
            in_specs=in_specs,
            out_specs=pl.BlockSpec((tb, pdims[-1]), lambda i: (i, 0)),
            compiler_params=pltpu.CompilerParams(**compiler_kwargs),
        )

    try:
        out_pad = build(True)(x_in, *wb_flat)
    except Exception:
        # Older jax without BlockSpec(pipeline_mode=...) support: default double-buffering.
        out_pad = build(False)(x_in, *wb_flat)

    return out_pad[:batch, :out_dim]


# ---------------------------------------------------------------------------
# Deterministic init mirroring DNN.__init__ layer shapes (PyTorch layout)
# ---------------------------------------------------------------------------
def init_dnn_params(key, num_hidden_layers, hidden_layer_size, input_size, output_size):
    sizes = [(input_size, hidden_layer_size)]
    for _ in range(num_hidden_layers):
        sizes.append((hidden_layer_size, hidden_layer_size))
    sizes.append((hidden_layer_size, output_size))

    params = []
    for (fan_in, fan_out) in sizes:
        key, kw, kb = jax.random.split(key, 3)
        bound = 1.0 / jnp.sqrt(jnp.float32(fan_in))
        w = jax.random.uniform(kw, (fan_out, fan_in), jnp.float32, -bound, bound)
        b = jax.random.uniform(kb, (fan_out,), jnp.float32, -bound, bound)
        params.append((w, b))
    return params


def dnn_forward_ref(params, x):
    """Pure-JAX reference matching the kernel's precision (bf16 operands, f32 acc)."""
    n = len(params)
    h = x.astype(jnp.bfloat16).astype(jnp.float32)
    for layer, (w, b) in enumerate(params):
        wt = w.astype(jnp.bfloat16).astype(jnp.float32)
        y = jnp.dot(h, wt.T, precision=jax.lax.Precision.HIGHEST) + b
        if layer < n - 1:
            y = jnp.maximum(y, 0.0)
            h = y.astype(jnp.bfloat16).astype(jnp.float32)
        else:
            h = y
    return h


if __name__ == "__main__":
    # Small shapes consistent with the module:
    # len(state_params) -> input_size, len(possible_actions) -> output_size.
    num_hidden_layers = 2
    hidden_layer_size = 32
    input_size = 8
    output_size = 4
    batch = 2

    key = jax.random.PRNGKey(0)
    key, kx = jax.random.split(key)
    x = jax.random.normal(kx, (batch, input_size), jnp.float32)

    params = init_dnn_params(key, num_hidden_layers, hidden_layer_size,
                             input_size, output_size)

    # One-time packing (transpose / pad / cast) -- reused across forward calls.
    packed = pack_params(params)
    packed = jax.tree_util.tree_map(
        lambda a: jax.block_until_ready(a) if isinstance(a, jax.Array) else a, packed)

    out = dnn_forward(packed, x)
    out = jax.block_until_ready(out)
    # Second call reuses packed weights: no per-call repacking in the hot path.
    out2 = jax.block_until_ready(dnn_forward(packed, x))

    ref = dnn_forward_ref(params, x)
    assert out.shape == (batch, output_size)
    assert jnp.allclose(out, ref, atol=2e-4, rtol=2e-4), (out, ref)
    assert jnp.allclose(out2, ref, atol=2e-4, rtol=2e-4), (out2, ref)

    print("KERNEL_OK")
</pallas_src>

<mosaic_0001>
module attributes {stable_mosaic.version = 11 : i64} {
  func.func @_fused_mlp_kernel(%arg0: i32, %arg1: memref<2x8xf32, #tpu.memory_space<vmem>>, %arg2: memref<8x128xbf16, #tpu.memory_space<vmem>>, %arg3: memref<1x128xf32, #tpu.memory_space<vmem>>, %arg4: memref<128x128xbf16, #tpu.memory_space<vmem>>, %arg5: memref<1x128xf32, #tpu.memory_space<vmem>>, %arg6: memref<128x128xbf16, #tpu.memory_space<vmem>>, %arg7: memref<1x128xf32, #tpu.memory_space<vmem>>, %arg8: memref<128x128xbf16, #tpu.memory_space<vmem>>, %arg9: memref<1x128xf32, #tpu.memory_space<vmem>>, %arg10: memref<2x128xf32, #tpu.memory_space<vmem>>) attributes {dimension_semantics = [#tpu.dimension_semantics<parallel>], iteration_bounds = array<i64: 1>, scalar_prefetch = 0 : i64, scratch_operands = 0 : i64, tpu.core_type = #tpu.core_type<tc>, window_params = [{transform_indices = @transform_0, window_bounds = array<i64: 2, 8>}, {pipeline_mode = #tpu.pipeline_mode<synchronous>, transform_indices = @transform_1, window_bounds = array<i64: 8, 128>}, {pipeline_mode = #tpu.pipeline_mode<synchronous>, transform_indices = @transform_2, window_bounds = array<i64: 1, 128>}, {pipeline_mode = #tpu.pipeline_mode<synchronous>, transform_indices = @transform_3, window_bounds = array<i64: 128, 128>}, {pipeline_mode = #tpu.pipeline_mode<synchronous>, transform_indices = @transform_4, window_bounds = array<i64: 1, 128>}, {pipeline_mode = #tpu.pipeline_mode<synchronous>, transform_indices = @transform_5, window_bounds = array<i64: 128, 128>}, {pipeline_mode = #tpu.pipeline_mode<synchronous>, transform_indices = @transform_6, window_bounds = array<i64: 1, 128>}, {pipeline_mode = #tpu.pipeline_mode<synchronous>, transform_indices = @transform_7, window_bounds = array<i64: 128, 128>}, {pipeline_mode = #tpu.pipeline_mode<synchronous>, transform_indices = @transform_8, window_bounds = array<i64: 1, 128>}, {transform_indices = @transform_9, window_bounds = array<i64: 2, 128>}]} {
    %c0 = arith.constant 0 : index
    %c0_0 = arith.constant 0 : index
    %0 = vector.load %arg1[%c0, %c0_0] : memref<2x8xf32, #tpu.memory_space<vmem>>, vector<2x8xf32>
    %1 = arith.truncf %0 : vector<2x8xf32> to vector<2x8xbf16>
    %c0_1 = arith.constant 0 : index
    %c0_2 = arith.constant 0 : index
    %2 = vector.load %arg2[%c0_1, %c0_2] : memref<8x128xbf16, #tpu.memory_space<vmem>>, vector<8x128xbf16>
    %cst = arith.constant dense<0.000000e+00> : vector<2x128xf32>
    %3 = tpu.matmul %1, %2, %cst {dimension_numbers = #tpu.dot_dimension_numbers<[1], [0], [0], [1], [0, 0, 1, 1], [], []>} : vector<2x8xbf16>, vector<8x128xbf16>, vector<2x128xf32> -> vector<2x128xf32>
    %c0_3 = arith.constant 0 : index
    %c0_4 = arith.constant 0 : index
    %4 = vector.load %arg3[%c0_3, %c0_4] : memref<1x128xf32, #tpu.memory_space<vmem>>, vector<1x128xf32>
    %5 = vector.broadcast %4 : vector<1x128xf32> to vector<2x128xf32>
    %6 = arith.addf %3, %5 : vector<2x128xf32>
    %cst_5 = arith.constant 0.000000e+00 : f32
    %7 = vector.broadcast %cst_5 : f32 to vector<2x128xf32>
    %8 = arith.maximumf %6, %7 : vector<2x128xf32>
    %9 = arith.truncf %8 : vector<2x128xf32> to vector<2x128xbf16>
    %c0_6 = arith.constant 0 : index
    %c0_7 = arith.constant 0 : index
    %10 = vector.load %arg4[%c0_6, %c0_7] : memref<128x128xbf16, #tpu.memory_space<vmem>>, vector<128x128xbf16>
    %cst_8 = arith.constant dense<0.000000e+00> : vector<2x128xf32>
    %11 = tpu.matmul %9, %10, %cst_8 {dimension_numbers = #tpu.dot_dimension_numbers<[1], [0], [0], [1], [0, 0, 1, 1], [], []>} : vector<2x128xbf16>, vector<128x128xbf16>, vector<2x128xf32> -> vector<2x128xf32>
    %c0_9 = arith.constant 0 : index
    %c0_10 = arith.constant 0 : index
    %12 = vector.load %arg5[%c0_9, %c0_10] : memref<1x128xf32, #tpu.memory_space<vmem>>, vector<1x128xf32>
    %13 = vector.broadcast %12 : vector<1x128xf32> to vector<2x128xf32>
    %14 = arith.addf %11, %13 : vector<2x128xf32>
    %cst_11 = arith.constant 0.000000e+00 : f32
    %15 = vector.broadcast %cst_11 : f32 to vector<2x128xf32>
    %16 = arith.maximumf %14, %15 : vector<2x128xf32>
    %17 = arith.truncf %16 : vector<2x128xf32> to vector<2x128xbf16>
    %c0_12 = arith.constant 0 : index
    %c0_13 = arith.constant 0 : index
    %18 = vector.load %arg6[%c0_12, %c0_13] : memref<128x128xbf16, #tpu.memory_space<vmem>>, vector<128x128xbf16>
    %cst_14 = arith.constant dense<0.000000e+00> : vector<2x128xf32>
    %19 = tpu.matmul %17, %18, %cst_14 {dimension_numbers = #tpu.dot_dimension_numbers<[1], [0], [0], [1], [0, 0, 1, 1], [], []>} : vector<2x128xbf16>, vector<128x128xbf16>, vector<2x128xf32> -> vector<2x128xf32>
    %c0_15 = arith.constant 0 : index
    %c0_16 = arith.constant 0 : index
    %20 = vector.load %arg7[%c0_15, %c0_16] : memref<1x128xf32, #tpu.memory_space<vmem>>, vector<1x128xf32>
    %21 = vector.broadcast %20 : vector<1x128xf32> to vector<2x128xf32>
    %22 = arith.addf %19, %21 : vector<2x128xf32>
    %cst_17 = arith.constant 0.000000e+00 : f32
    %23 = vector.broadcast %cst_17 : f32 to vector<2x128xf32>
    %24 = arith.maximumf %22, %23 : vector<2x128xf32>
    %25 = arith.truncf %24 : vector<2x128xf32> to vector<2x128xbf16>
    %c0_18 = arith.constant 0 : index
    %c0_19 = arith.constant 0 : index
    %26 = vector.load %arg8[%c0_18, %c0_19] : memref<128x128xbf16, #tpu.memory_space<vmem>>, vector<128x128xbf16>
    %cst_20 = arith.constant dense<0.000000e+00> : vector<2x128xf32>
    %27 = tpu.matmul %25, %26, %cst_20 {dimension_numbers = #tpu.dot_dimension_numbers<[1], [0], [0], [1], [0, 0, 1, 1], [], []>} : vector<2x128xbf16>, vector<128x128xbf16>, vector<2x128xf32> -> vector<2x128xf32>
    %c0_21 = arith.constant 0 : index
    %c0_22 = arith.constant 0 : index
    %28 = vector.load %arg9[%c0_21, %c0_22] : memref<1x128xf32, #tpu.memory_space<vmem>>, vector<1x128xf32>
    %29 = vector.broadcast %28 : vector<1x128xf32> to vector<2x128xf32>
    %30 = arith.addf %27, %29 : vector<2x128xf32>
    %c0_23 = arith.constant 0 : index
    %c0_24 = arith.constant 0 : index
    %31 = vector.load %arg10[%c0_23, %c0_24] : memref<2x128xf32, #tpu.memory_space<vmem>>, vector<2x128xf32>
    tpu.vector_store %arg10[%c0_23, %c0_24], %30 {strides = array<i32>} : memref<2x128xf32, #tpu.memory_space<vmem>>, vector<2x128xf32>,
    return
  }
  func.func @transform_0(%arg0: i32) -> (i32, i32) {
    %c0_i32 = arith.constant 0 : i32
    %c0_i32_0 = arith.constant 0 : i32
    return %arg0, %c0_i32 : i32, i32
  }
  func.func @transform_1(%arg0: i32) -> (i32, i32) {
    %c0_i32 = arith.constant 0 : i32
    %c0_i32_0 = arith.constant 0 : i32
    %c0_i32_1 = arith.constant 0 : i32
    return %c0_i32, %c0_i32_0 : i32, i32
  }
  func.func @transform_2(%arg0: i32) -> (i32, i32) {
    %c0_i32 = arith.constant 0 : i32
    %c0_i32_0 = arith.constant 0 : i32
    %c0_i32_1 = arith.constant 0 : i32
    return %c0_i32, %c0_i32_0 : i32, i32
  }
  func.func @transform_3(%arg0: i32) -> (i32, i32) {
    %c0_i32 = arith.constant 0 : i32
    %c0_i32_0 = arith.constant 0 : i32
    %c0_i32_1 = arith.constant 0 : i32
    return %c0_i32, %c0_i32_0 : i32, i32
  }
  func.func @transform_4(%arg0: i32) -> (i32, i32) {
    %c0_i32 = arith.constant 0 : i32
    %c0_i32_0 = arith.constant 0 : i32
    %c0_i32_1 = arith.constant 0 : i32
    return %c0_i32, %c0_i32_0 : i32, i32
  }
  func.func @transform_5(%arg0: i32) -> (i32, i32) {
    %c0_i32 = arith.constant 0 : i32
    %c0_i32_0 = arith.constant 0 : i32
    %c0_i32_1 = arith.constant 0 : i32
    return %c0_i32, %c0_i32_0 : i32, i32
  }
  func.func @transform_6(%arg0: i32) -> (i32, i32) {
    %c0_i32 = arith.constant 0 : i32
    %c0_i32_0 = arith.constant 0 : i32
    %c0_i32_1 = arith.constant 0 : i32
    return %c0_i32, %c0_i32_0 : i32, i32
  }
  func.func @transform_7(%arg0: i32) -> (i32, i32) {
    %c0_i32 = arith.constant 0 : i32
    %c0_i32_0 = arith.constant 0 : i32
    %c0_i32_1 = arith.constant 0 : i32
    return %c0_i32, %c0_i32_0 : i32, i32
  }
  func.func @transform_8(%arg0: i32) -> (i32, i32) {
    %c0_i32 = arith.constant 0 : i32
    %c0_i32_0 = arith.constant 0 : i32
    %c0_i32_1 = arith.constant 0 : i32
    return %c0_i32, %c0_i32_0 : i32, i32
  }
  func.func @transform_9(%arg0: i32) -> (i32, i32) {
    %c0_i32 = arith.constant 0 : i32
    %c0_i32_0 = arith.constant 0 : i32
    return %arg0, %c0_i32 : i32, i32
  }
}

module attributes {stable_mosaic.version = 11 : i64} {
  func.func @_fused_mlp_kernel(%arg0: i32, %arg1: memref<2x8xf32, #tpu.memory_space<vmem>>, %arg2: memref<8x128xbf16, #tpu.memory_space<vmem>>, %arg3: memref<1x128xf32, #tpu.memory_space<vmem>>, %arg4: memref<128x128xbf16, #tpu.memory_space<vmem>>, %arg5: memref<1x128xf32, #tpu.memory_space<vmem>>, %arg6: memref<128x128xbf16, #tpu.memory_space<vmem>>, %arg7: memref<1x128xf32, #tpu.memory_space<vmem>>, %arg8: memref<128x128xbf16, #tpu.memory_space<vmem>>, %arg9: memref<1x128xf32, #tpu.memory_space<vmem>>, %arg10: memref<2x128xf32, #tpu.memory_space<vmem>>) attributes {dimension_semantics = [#tpu.dimension_semantics<parallel>], iteration_bounds = array<i64: 1>, scalar_prefetch = 0 : i64, scratch_operands = 0 : i64, tpu.core_type = #tpu.core_type<tc>, window_params = [{transform_indices = @transform_0, window_bounds = array<i64: 2, 8>}, {pipeline_mode = #tpu.pipeline_mode<synchronous>, transform_indices = @transform_1, window_bounds = array<i64: 8, 128>}, {pipeline_mode = #tpu.pipeline_mode<synchronous>, transform_indices = @transform_2, window_bounds = array<i64: 1, 128>}, {pipeline_mode = #tpu.pipeline_mode<synchronous>, transform_indices = @transform_3, window_bounds = array<i64: 128, 128>}, {pipeline_mode = #tpu.pipeline_mode<synchronous>, transform_indices = @transform_4, window_bounds = array<i64: 1, 128>}, {pipeline_mode = #tpu.pipeline_mode<synchronous>, transform_indices = @transform_5, window_bounds = array<i64: 128, 128>}, {pipeline_mode = #tpu.pipeline_mode<synchronous>, transform_indices = @transform_6, window_bounds = array<i64: 1, 128>}, {pipeline_mode = #tpu.pipeline_mode<synchronous>, transform_indices = @transform_7, window_bounds = array<i64: 128, 128>}, {pipeline_mode = #tpu.pipeline_mode<synchronous>, transform_indices = @transform_8, window_bounds = array<i64: 1, 128>}, {transform_indices = @transform_9, window_bounds = array<i64: 2, 128>}]} {
    %c0 = arith.constant 0 : index
    %c0_0 = arith.constant 0 : index
    %0 = vector.load %arg1[%c0, %c0_0] : memref<2x8xf32, #tpu.memory_space<vmem>>, vector<2x8xf32>
    %1 = arith.truncf %0 : vector<2x8xf32> to vector<2x8xbf16>
    %c0_1 = arith.constant 0 : index
    %c0_2 = arith.constant 0 : index
    %2 = vector.load %arg2[%c0_1, %c0_2] : memref<8x128xbf16, #tpu.memory_space<vmem>>, vector<8x128xbf16>
    %cst = arith.constant dense<0.000000e+00> : vector<2x128xf32>
    %3 = tpu.matmul %1, %2, %cst {dimension_numbers = #tpu.dot_dimension_numbers<[1], [0], [0], [1], [0, 0, 1, 1], [], []>} : vector<2x8xbf16>, vector<8x128xbf16>, vector<2x128xf32> -> vector<2x128xf32>
    %c0_3 = arith.constant 0 : index
    %c0_4 = arith.constant 0 : index
    %4 = vector.load %arg3[%c0_3, %c0_4] : memref<1x128xf32, #tpu.memory_space<vmem>>, vector<1x128xf32>
    %5 = vector.broadcast %4 : vector<1x128xf32> to vector<2x128xf32>
    %6 = arith.addf %3, %5 : vector<2x128xf32>
    %cst_5 = arith.constant 0.000000e+00 : f32
    %7 = vector.broadcast %cst_5 : f32 to vector<2x128xf32>
    %8 = arith.maximumf %6, %7 : vector<2x128xf32>
    %9 = arith.truncf %8 : vector<2x128xf32> to vector<2x128xbf16>
    %c0_6 = arith.constant 0 : index
    %c0_7 = arith.constant 0 : index
    %10 = vector.load %arg4[%c0_6, %c0_7] : memref<128x128xbf16, #tpu.memory_space<vmem>>, vector<128x128xbf16>
    %cst_8 = arith.constant dense<0.000000e+00> : vector<2x128xf32>
    %11 = tpu.matmul %9, %10, %cst_8 {dimension_numbers = #tpu.dot_dimension_numbers<[1], [0], [0], [1], [0, 0, 1, 1], [], []>} : vector<2x128xbf16>, vector<128x128xbf16>, vector<2x128xf32> -> vector<2x128xf32>
    %c0_9 = arith.constant 0 : index
    %c0_10 = arith.constant 0 : index
    %12 = vector.load %arg5[%c0_9, %c0_10] : memref<1x128xf32, #tpu.memory_space<vmem>>, vector<1x128xf32>
    %13 = vector.broadcast %12 : vector<1x128xf32> to vector<2x128xf32>
    %14 = arith.addf %11, %13 : vector<2x128xf32>
    %cst_11 = arith.constant 0.000000e+00 : f32
    %15 = vector.broadcast %cst_11 : f32 to vector<2x128xf32>
    %16 = arith.maximumf %14, %15 : vector<2x128xf32>
    %17 = arith.truncf %16 : vector<2x128xf32> to vector<2x128xbf16>
    %c0_12 = arith.constant 0 : index
    %c0_13 = arith.constant 0 : index
    %18 = vector.load %arg6[%c0_12, %c0_13] : memref<128x128xbf16, #tpu.memory_space<vmem>>, vector<128x128xbf16>
    %cst_14 = arith.constant dense<0.000000e+00> : vector<2x128xf32>
    %19 = tpu.matmul %17, %18, %cst_14 {dimension_numbers = #tpu.dot_dimension_numbers<[1], [0], [0], [1], [0, 0, 1, 1], [], []>} : vector<2x128xbf16>, vector<128x128xbf16>, vector<2x128xf32> -> vector<2x128xf32>
    %c0_15 = arith.constant 0 : index
    %c0_16 = arith.constant 0 : index
    %20 = vector.load %arg7[%c0_15, %c0_16] : memref<1x128xf32, #tpu.memory_space<vmem>>, vector<1x128xf32>
    %21 = vector.broadcast %20 : vector<1x128xf32> to vector<2x128xf32>
    %22 = arith.addf %19, %21 : vector<2x128xf32>
    %cst_17 = arith.constant 0.000000e+00 : f32
    %23 = vector.broadcast %cst_17 : f32 to vector<2x128xf32>
    %24 = arith.maximumf %22, %23 : vector<2x128xf32>
    %25 = arith.truncf %24 : vector<2x128xf32> to vector<2x128xbf16>
    %c0_18 = arith.constant 0 : index
    %c0_19 = arith.constant 0 : index
    %26 = vector.load %arg8[%c0_18, %c0_19] : memref<128x128xbf16, #tpu.memory_space<vmem>>, vector<128x128xbf16>
    %cst_20 = arith.constant dense<0.000000e+00> : vector<2x128xf32>
    %27 = tpu.matmul %25, %26, %cst_20 {dimension_numbers = #tpu.dot_dimension_numbers<[1], [0], [0], [1], [0, 0, 1, 1], [], []>} : vector<2x128xbf16>, vector<128x128xbf16>, vector<2x128xf32> -> vector<2x128xf32>
    %c0_21 = arith.constant 0 : index
    %c0_22 = arith.constant 0 : index
    %28 = vector.load %arg9[%c0_21, %c0_22] : memref<1x128xf32, #tpu.memory_space<vmem>>, vector<1x128xf32>
    %29 = vector.broadcast %28 : vector<1x128xf32> to vector<2x128xf32>
    %30 = arith.addf %27, %29 : vector<2x128xf32>
    %c0_23 = arith.constant 0 : index
    %c0_24 = arith.constant 0 : index
    %31 = vector.load %arg10[%c0_23, %c0_24] : memref<2x128xf32, #tpu.memory_space<vmem>>, vector<2x128xf32>
    tpu.vector_store %arg10[%c0_23, %c0_24], %30 {strides = array<i32>} : memref<2x128xf32, #tpu.memory_space<vmem>>, vector<2x128xf32>,
    return
  }
  func.func @transform_0(%arg0: i32) -> (i32, i32) {
    %c0_i32 = arith.constant 0 : i32
    %c0_i32_0 = arith.constant 0 : i32
    return %arg0, %c0_i32 : i32, i32
  }
  func.func @transform_1(%arg0: i32) -> (i32, i32) {
    %c0_i32 = arith.constant 0 : i32
    %c0_i32_0 = arith.constant 0 : i32
    %c0_i32_1 = arith.constant 0 : i32
    return %c0_i32, %c0_i32_0 : i32, i32
  }
  func.func @transform_2(%arg0: i32) -> (i32, i32) {
    %c0_i32 = arith.constant 0 : i32
    %c0_i32_0 = arith.constant 0 : i32
    %c0_i32_1 = arith.constant 0 : i32
    return %c0_i32, %c0_i32_0 : i32, i32
  }
  func.func @transform_3(%arg0: i32) -> (i32, i32) {
    %c0_i32 = arith.constant 0 : i32
    %c0_i32_0 = arith.constant 0 : i32
    %c0_i32_1 = arith.constant 0 : i32
    return %c0_i32, %c0_i32_0 : i32, i32
  }
  func.func @transform_4(%arg0: i32) -> (i32, i32) {
    %c0_i32 = arith.constant 0 : i32
    %c0_i32_0 = arith.constant 0 : i32
    %c0_i32_1 = arith.constant 0 : i32
    return %c0_i32, %c0_i32_0 : i32, i32
  }
  func.func @transform_5(%arg0: i32) -> (i32, i32) {
    %c0_i32 = arith.constant 0 : i32
    %c0_i32_0 = arith.constant 0 : i32
    %c0_i32_1 = arith.constant 0 : i32
    return %c0_i32, %c0_i32_0 : i32, i32
  }
  func.func @transform_6(%arg0: i32) -> (i32, i32) {
    %c0_i32 = arith.constant 0 : i32
    %c0_i32_0 = arith.constant 0 : i32
    %c0_i32_1 = arith.constant 0 : i32
    return %c0_i32, %c0_i32_0 : i32, i32
  }
  func.func @transform_7(%arg0: i32) -> (i32, i32) {
    %c0_i32 = arith.constant 0 : i32
    %c0_i32_0 = arith.constant 0 : i32
    %c0_i32_1 = arith.constant 0 : i32
    return %c0_i32, %c0_i32_0 : i32, i32
  }
  func.func @transform_8(%arg0: i32) -> (i32, i32) {
    %c0_i32 = arith.constant 0 : i32
    %c0_i32_0 = arith.constant 0 : i32
    %c0_i32_1 = arith.constant 0 : i32
    return %c0_i32, %c0_i32_0 : i32, i32
  }
  func.func @transform_9(%arg0: i32) -> (i32, i32) {
    %c0_i32 = arith.constant 0 : i32
    %c0_i32_0 = arith.constant 0 : i32
    return %arg0, %c0_i32 : i32, i32
  }
}

</mosaic_0001>

<bundles_post_ra>
// kernel: tpu_custom_call.1
= control target key start
LH: loop header
LB: loop body
LE: loop exit
PB: predicated region body
PF: predicated region fallthrough
CT: control target
= control target key end

     0   :  { %14 = vsyncpa [#allocation3], 0  ;;  %s931_s0 = inlined_call_operand.hbm [shape: f32[2,8], index: 0, kind: input, shape index: {}]   ;;  %s932_s1 = inlined_call_operand.hbm [shape: bf16[8,128], index: 1, kind: input, shape index: {}]   ;;  %s933_s2 = inlined_call_operand.vmem [shape: f32[1,128], index: 2, kind: input, shape index: {}]   ;;  %s934_s3 = inlined_call_operand.hbm [shape: bf16[128,128], index: 3, kind: input, shape index: {}]   ;;  %s935_s4 = inlined_call_operand.vmem [shape: f32[1,128], index: 4, kind: input, shape index: {}]   ;;  %s936_s5 = inlined_call_operand.hbm [shape: bf16[128,128], index: 5, kind: input, shape index: {}]   ;;  %s937_s6 = inlined_call_operand.vmem [shape: f32[1,128], index: 6, kind: input, shape index: {}]   ;;  %s938_s7 = inlined_call_operand.hbm [shape: bf16[128,128], index: 7, kind: input, shape index: {}]   ;;  %s939_s8 = inlined_call_operand.vmem [shape: f32[1,128], index: 8, kind: input, shape index: {}]   ;;  %s940_s9 = inlined_call_operand.hbm [shape: f32[2,128], index: 9, kind: output, shape index: {}]  }
   0x1   :  { %15 = vsyncpa [#allocation6], 0 }
   0x2   :  { %16 = vsyncpa [#allocation9], 0 }
   0x3   :  { %17 = vsyncpa [#allocation4], 0  ;;  %s799_s30 = smov [#allocation5]  }
   0x4   :  { %s34_s10 = sshll.u32 %s799_s30, 4  ;;  %s35_s10 = int_to_ptr.vmem [resolvable:$true] %s34_s10 }
   0x5   :  { %s679_s11 = scalar_lea.vmem %s35_s10, 64  ;;  %p684_p1 = scmp.lt.s32.totalorder %s35_s10, %s35_s10 }
   0x6   :  { %p680_p0 = scmp.ne.s32.totalorder %s35_s10, %s679_s11  ;;  %p685_p2 = scmp.lt.s32.totalorder %s679_s11, %s679_s11 }
   0x8   :  { %p686_p3 = por %p685_p2, %p684_p1 }
   0xa   :  { %p687_p4 = pnand %p686_p3, %p680_p0 }
   0xc   :  { %690 = shalt.err (!%p687_p4)
}
   0xd   :  { %37 = dma.hbm_to_vmem [thread:$0]  %s932_s1, 64, %s35_s10, [#allocation6]  }
   0xe   :  { %s800_s14 = smov [#allocation8]   ;;  %s801_s16 = smov [#allocation2]  }
   0xf   :  { %s59_s15 = sshll.u32 %s800_s14, 4  ;;  %s24_s17 = sshll.u32 %s801_s16, 4  ;;  %s60_s15 = int_to_ptr.vmem [resolvable:$true] %s59_s15  ;;  %s25_s17 = int_to_ptr.vmem [resolvable:$true] %s24_s17 }
  0x10   :  { %s699_s18 = scalar_lea.vmem %s60_s15, 1024  ;;  %p704_p6 = scmp.lt.s32.totalorder %s60_s15, %s60_s15 }
  0x11   :  { %p700_p5 = scmp.ne.s32.totalorder %s60_s15, %s699_s18  ;;  %p705_p7 = scmp.lt.s32.totalorder %s699_s18, %s699_s18 }
  0x13   :  { %p706_p8 = por %p705_p7, %p704_p6 }
  0x15   :  { %p707_p9 = pnand %p706_p8, %p700_p5 }
  0x17   :  { %710 = shalt.err (!%p707_p9)
}
  0x18   :  { %s802_s19 = smov 64   ;;  %s803_s20 = smov 4  }
  0x19   :  { %65 = dma.hbm_to_vmem [thread:$0]  %s936_s5, 1024, %s60_s15, [#allocation9], %s802_s19, %s802_s19, %s803_s20  }
  0x1a   :  { %s719_s1 = scalar_lea.vmem %s25_s17, 32  ;;  %p724_p11 = scmp.lt.s32.totalorder %s25_s17, %s25_s17 }
  0x1b   :  { %p720_p10 = scmp.ne.s32.totalorder %s25_s17, %s719_s1  ;;  %p725_p12 = scmp.lt.s32.totalorder %s719_s1, %s719_s1 }
  0x1d   :  { %p726_p13 = por %p725_p12, %p724_p11 }
  0x1f   :  { %p727_p0 = pnand %p726_p13, %p720_p10 }
  0x21   :  { %730 = shalt.err (!%p727_p0)
}
  0x22   :  { %27 = dma.hbm_to_vmem [thread:$0]  %s931_s0, 32, %s25_s17, [#allocation3]  }
  0x23   :  { %s804_s25 = smov [#allocation7]   ;;  %s805_s27 = smov [#allocation10]  }
  0x24   :  { %s45_s26 = sshll.u32 %s804_s25, 4  ;;  %s73_s28 = sshll.u32 %s805_s27, 4  ;;  %s46_s26 = int_to_ptr.vmem [resolvable:$true] %s45_s26  ;;  %s74_s28 = int_to_ptr.vmem [resolvable:$true] %s73_s28 }
  0x25   :  { %s739_s29 = scalar_lea.vmem %s46_s26, 1024  ;;  %p744_p2 = scmp.lt.s32.totalorder %s46_s26, %s46_s26 }
  0x26   :  { %p740_p1 = scmp.ne.s32.totalorder %s46_s26, %s739_s29  ;;  %p745_p3 = scmp.lt.s32.totalorder %s739_s29, %s739_s29 }
  0x28   :  { %p746_p4 = por %p745_p3, %p744_p2 }
  0x2a   :  { %p747_p5 = pnand %p746_p4, %p740_p1 }
  0x2c   :  { %750 = shalt.err (!%p747_p5)
}
  0x2d   :  { %51 = dma.hbm_to_vmem [thread:$0]  %s934_s3, 1024, %s46_s26, [#allocation6], %s802_s19, %s802_s19, %s803_s20  }
  0x2e   :  { %s759_s0 = scalar_lea.vmem %s74_s28, 1024  ;;  %p764_p7 = scmp.lt.s32.totalorder %s74_s28, %s74_s28 }
  0x2f   :  { %p760_p6 = scmp.ne.s32.totalorder %s74_s28, %s759_s0  ;;  %p765_p8 = scmp.lt.s32.totalorder %s759_s0, %s759_s0 }
  0x31   :  { %p766_p9 = por %p765_p8, %p764_p7 }
  0x33   :  { %p767_p10 = pnand %p766_p9, %p760_p6 }
  0x35   :  { %770 = shalt.err (!%p767_p10)
}
  0x36   :  { %79 = dma.hbm_to_vmem [thread:$0]  %s938_s7, 1024, %s74_s28, [#allocation9], %s802_s19, %s802_s19, %s803_s20  }
  0x37   :  { %791 = dma.done.wait [#allocation3], 32  }
  0x38   :  { %792 = vsyncadd [#allocation3], 4294967264 }
  0x39   :  { %793 = dma.done.wait [#allocation6], 1088  }
  0x3a   :  { %794 = vsyncadd [#allocation6], 4294966208 }
  0x3b   :  { %795 = dma.done.wait [#allocation9], 2048  }
  0x3c   :  { %796 = vsyncadd [#allocation9], 4294965248  ;;  %v806_v0 = vmov 0.0   ;;  %vm807_vm0 = vmmov 0   ;;  %vm112_vm1 = vcmask 1043456   ;;  %v647_v5 = vld [vmem:[#allocation7 + $0x38] sm:$0xff]  }
  0x3d   :  { %571 = vmatprep.subr.bf16.mxu0 %v806_v0  ;;  %573 = vmatprep.mubr.msk.bf16.mxu0 %vm807_vm0, %v806_v0  ;;  %v100_v1 = vld [vmem:[#allocation5] sm:$0xf]  ;;  %v98_v2 = vld [vmem:[#allocation2] sm:$0x3]  ;;  %vm108_vm2 = vcmask 64512   ;;  %v648_v6 = vld [vmem:[#allocation7 + $0x30] sm:$0xff]  }
  0x3e   :  { %577 = vmatprep.subr.bf16.mxu1 %v806_v0  ;;  %593 = vmatprep.mubr.msk.bf16.mxu1 %vm807_vm0, %v806_v0  ;;  %v114_v3 = vsel %vm112_vm1, %v100_v1, 0  ;;  %v99_v4 = vpack.c.bf16 %v98_v2, %v98_v2  ;;  %v649_v7 = vld [vmem:[#allocation7 + $0x28] sm:$0xff]   ;;  %v650_v8 = vld [vmem:[#allocation7 + $0x20] sm:$0xff]   ;;  %v651_v9 = vld [vmem:[#allocation7 + $0x18] sm:$0xff]   ;;  %s808_s16 = smov [#allocation11]  }
  0x3f   :  { %572 = vmatpush3.bf16.msra.mxu0 %v114_v3  ;;  %578 = vmatpush3.bf16.msra.mxu1 %v647_v5  ;;  %v652_v10 = vld [vmem:[#allocation7 + $0x10] sm:$0xff]   ;;  %v653_v11 = vld [vmem:[#allocation7 + $0x8] sm:$0xff]   ;;  %v654_v12 = vld [vmem:[#allocation7] sm:$0xff]   ;;  %s502_s17 = sshll.u32 %s808_s16, 4  ;;  %s503_s17 = int_to_ptr.vmem [resolvable:$true] %s502_s17 }
  0x40   :  { %597 = vmatprep.subr.bf16.mxu0 %v806_v0  ;;  %579 = vmatprep.subr.bf16.mxu1 %v806_v0  ;;  %v655_v13 = vld [vmem:[#allocation8 + $0x38] sm:$0xff]   ;;  %v656_v14 = vld [vmem:[#allocation8 + $0x30] sm:$0xff]   ;;  %v657_v15 = vld [vmem:[#allocation8 + $0x28] sm:$0xff]   ;;  %p776_p12 = scmp.lt.s32.totalorder %s503_s17, %s503_s17 }
  0x41   :  { %v658_v16 = vld [vmem:[#allocation8 + $0x20] sm:$0xff]   ;;  %v659_v17 = vld [vmem:[#allocation8 + $0x18] sm:$0xff]   ;;  %v660_v18 = vld [vmem:[#allocation8 + $0x10] sm:$0xff]  }
  0x42   :  { %574 = vmatmul.mubr.msk.bf16.vlgmr.msra.gmra.mxu0 %vm108_vm2, %v99_v4  ;;  %v513_v19 = vld [vmem:[%s933_s2] ss:$0 sm:$0xff]  ;;  %v661_v27 = vld [vmem:[#allocation8 + $0x8] sm:$0xff]   ;;  %v662_v28 = vld [vmem:[#allocation8] sm:$0xff]  }
  0x43   :  { %613 = vmatprep.mubr.msk.bf16.mxu0 %vm807_vm0, %v806_v0  ;;  %580 = vmatpush3.bf16.msra.mxu1 %v648_v6  ;;  %v663_v29 = vld [vmem:[#allocation10 + $0x38] sm:$0xff]   ;;  %v664_v30 = vld [vmem:[#allocation10 + $0x30] sm:$0xff]   ;;  %v665_v31 = vld [vmem:[#allocation10 + $0x28] sm:$0xff]  }
  0x44   :  { %581 = vmatprep.subr.bf16.mxu1 %v806_v0  ;;  %598 = vmatpush3.bf16.msra.mxu0 %v655_v13  ;;  %v666_v32 = vld [vmem:[#allocation10 + $0x20] sm:$0xff]   ;;  %v667_v33 = vld [vmem:[#allocation10 + $0x18] sm:$0xff]   ;;  %v668_v34 = vld [vmem:[#allocation10 + $0x10] sm:$0xff]  }
  0x45   :  { %599 = vmatprep.subr.bf16.mxu0 %v806_v0  ;;  %v515_v35 = vld [vmem:[%s935_s4] ss:$0 sm:$0xff]  ;;  %v669_v43 = vld [vmem:[#allocation10 + $0x8] sm:$0xff]   ;;  %v670_v44 = vld [vmem:[#allocation10] sm:$0xff]  }
  0x46   :  { %v524_v45 = vld [vmem:[%s937_s6] ss:$0 sm:$0xff]  ;;  %s771_s6 = scalar_lea.vmem %s503_s17, 32 }
  0x47   :  { %582 = vmatpush3.bf16.msra.mxu1 %v649_v7  ;;  %v533_v53 = vld [vmem:[%s939_s8] ss:$0 sm:$0xff]  ;;  %p772_p11 = scmp.ne.s32.totalorder %s503_s17, %s771_s6  ;;  %p777_p13 = scmp.lt.s32.totalorder %s771_s6, %s771_s6 }
  0x48   :  { %583 = vmatprep.subr.bf16.mxu1 %v806_v0  ;;  %600 = vmatpush3.bf16.msra.mxu0 %v656_v14 }
  0x49   :  { %601 = vmatprep.subr.bf16.mxu0 %v806_v0  ;;  %p778_p0 = por %p777_p13, %p776_p12 }
  0x4b   :  { %584 = vmatpush3.bf16.msra.mxu1 %v650_v8  ;;  %p779_p1 = pnand %p778_p0, %p772_p11 }
  0x4c   :  { %585 = vmatprep.subr.bf16.mxu1 %v806_v0  ;;  %602 = vmatpush3.bf16.msra.mxu0 %v657_v15 }
  0x4d   :  { %603 = vmatprep.subr.bf16.mxu0 %v806_v0 }
  0x4f   :  { %586 = vmatpush3.bf16.msra.mxu1 %v651_v9 }
  0x50   :  { %587 = vmatprep.subr.bf16.mxu1 %v806_v0  ;;  %604 = vmatpush3.bf16.msra.mxu0 %v658_v16 }
  0x51   :  { %605 = vmatprep.subr.bf16.mxu0 %v806_v0 }
  0x53   :  { %588 = vmatpush3.bf16.msra.mxu1 %v652_v10 }
  0x54   :  { %589 = vmatprep.subr.bf16.mxu1 %v806_v0  ;;  %606 = vmatpush3.bf16.msra.mxu0 %v659_v17 }
  0x55   :  { %607 = vmatprep.subr.bf16.mxu0 %v806_v0 }
  0x57   :  { %590 = vmatpush3.bf16.msra.mxu1 %v653_v11 }
  0x58   :  { %591 = vmatprep.subr.bf16.mxu1 %v806_v0  ;;  %608 = vmatpush3.bf16.msra.mxu0 %v660_v18 }
  0x59   :  { %609 = vmatprep.subr.bf16.mxu0 %v806_v0 }
  0x5b   :  { %592 = vmatpush3.bf16.msra.mxu1 %v654_v12 }
  0x5c   :  { %617 = vmatprep.subr.bf16.mxu1 %v806_v0  ;;  %610 = vmatpush3.bf16.msra.mxu0 %v661_v27 }
  0x5d   :  { %611 = vmatprep.subr.bf16.mxu0 %v806_v0 }
  0x60   :  { %612 = vmatpush3.bf16.msra.mxu0 %v662_v28 }
 0x102   :  { %v150_v20 = vpop.f32.mrf.mxu0 }
 0x103   :  { %v151_v21 = vadd.f32 %v513_v19, %v150_v20 }
 0x104   :  { %v575_v22 = vpop.f32.mrf.mxu0 }
 0x105   :  { %v156_v23 = vmax.f32 %v151_v21, 0.0 }
 0x106   :  { %v153_v24 = vpop.f32.mrf.mxu0 }
 0x107   :  { %v157_v25 = vpack.c.bf16 %v156_v23, %v156_v23 }
 0x108   :  { %v576_v26 = vpop.f32.mrf.mxu0 }
 0x109   :  { %594 = vmatmul.mubr.bf16.vlgmr.msra.gmra.mxu1 %v157_v25 }
 0x10a   :  { %633 = vmatprep.mubr.msk.bf16.mxu1 %vm807_vm0, %v806_v0  ;;  %618 = vmatpush3.bf16.msra.mxu1 %v663_v29 }
 0x10b   :  { %619 = vmatprep.subr.bf16.mxu1 %v806_v0 }
 0x10e   :  { %620 = vmatpush3.bf16.msra.mxu1 %v664_v30 }
 0x10f   :  { %621 = vmatprep.subr.bf16.mxu1 %v806_v0 }
 0x112   :  { %622 = vmatpush3.bf16.msra.mxu1 %v665_v31 }
 0x113   :  { %623 = vmatprep.subr.bf16.mxu1 %v806_v0 }
 0x116   :  { %624 = vmatpush3.bf16.msra.mxu1 %v666_v32 }
 0x117   :  { %625 = vmatprep.subr.bf16.mxu1 %v806_v0 }
 0x11a   :  { %626 = vmatpush3.bf16.msra.mxu1 %v667_v33 }
 0x11b   :  { %627 = vmatprep.subr.bf16.mxu1 %v806_v0 }
 0x11e   :  { %628 = vmatpush3.bf16.msra.mxu1 %v668_v34 }
 0x11f   :  { %629 = vmatprep.subr.bf16.mxu1 %v806_v0 }
 0x122   :  { %630 = vmatpush3.bf16.msra.mxu1 %v669_v43 }
 0x123   :  { %631 = vmatprep.subr.bf16.mxu1 %v806_v0 }
 0x126   :  { %632 = vmatpush3.bf16.msra.mxu1 %v670_v44 }
 0x1c9   :  { %v263_v36 = vpop.f32.mrf.mxu1 }
 0x1ca   :  { %v264_v37 = vadd.f32 %v515_v35, %v263_v36 }
 0x1cb   :  { %v595_v38 = vpop.f32.mrf.mxu1 }
 0x1cc   :  { %v269_v39 = vmax.f32 %v264_v37, 0.0 }
 0x1cd   :  { %v266_v40 = vpop.f32.mrf.mxu1 }
 0x1ce   :  { %v270_v41 = vpack.c.bf16 %v269_v39, %v269_v39 }
 0x1cf   :  { %v596_v42 = vpop.f32.mrf.mxu1 }
 0x1d0   :  { %614 = vmatmul.mubr.bf16.vlgmr.msra.gmra.mxu0 %v270_v41 }
 0x290   :  { %v376_v46 = vpop.f32.mrf.mxu0 }
 0x291   :  { %v377_v47 = vadd.f32 %v524_v45, %v376_v46 }
 0x292   :  { %v615_v48 = vpop.f32.mrf.mxu0 }
 0x293   :  { %v382_v49 = vmax.f32 %v377_v47, 0.0 }
 0x294   :  { %v379_v50 = vpop.f32.mrf.mxu0 }
 0x295   :  { %v383_v51 = vpack.c.bf16 %v382_v49, %v382_v49 }
 0x296   :  { %v616_v52 = vpop.f32.mrf.mxu0 }
 0x297   :  { %634 = vmatmul.mubr.bf16.vlgmr.msra.gmra.mxu1 %v383_v51 }
 0x357   :  { %v489_v54 = vpop.f32.mrf.mxu1 }
 0x358   :  { %v490_v55 = vadd.f32 %v533_v53, %v489_v54 }
 0x359   :  { %v635_v56 = vpop.f32.mrf.mxu1 }
 0x35a   :  { %495 = vst [vmem:[#allocation11] sm:$0x3] %v490_v55 }
 0x35b   :  { %v492_v57 = vpop.f32.mrf.mxu1 }
 0x35c   :  { %782 = shalt.err (!%p779_p1)
}
 0x35d   :  { %505 = dma.vmem_to_hbm [thread:$0]  %s503_s17, 32, %s940_s9, [#allocation4]   ;;  %v636_v58 = vpop.f32.mrf.mxu1 }
 0x35e   :  { %797 = dma.done.wait [#allocation4], 32  }
 0x35f   :  { %798 = vsyncadd [#allocation4], 4294967264 }
 0x360   :  { %509 = vsyncpa [#allocation3], 1 }
 0x361   :  { %510 = vsyncpa [#allocation6], 1 }
 0x362   :  { %511 = vsyncpa [#allocation9], 1 }
 0x363   :  { %512 = vsyncpa [#allocation4], 1 }

// kernel: tpu_custom_call.1
= control target key start
LH: loop header
LB: loop body
LE: loop exit
PB: predicated region body
PF: predicated region fallthrough
CT: control target
= control target key end

     0   :  { %14 = vsyncpa [#allocation3], 0  ;;  %s931_s0 = inlined_call_operand.hbm [shape: f32[2,8], index: 0, kind: input, shape index: {}]   ;;  %s932_s1 = inlined_call_operand.hbm [shape: bf16[8,128], index: 1, kind: input, shape index: {}]   ;;  %s933_s2 = inlined_call_operand.vmem [shape: f32[1,128], index: 2, kind: input, shape index: {}]   ;;  %s934_s3 = inlined_call_operand.hbm [shape: bf16[128,128], index: 3, kind: input, shape index: {}]   ;;  %s935_s4 = inlined_call_operand.vmem [shape: f32[1,128], index: 4, kind: input, shape index: {}]   ;;  %s936_s5 = inlined_call_operand.hbm [shape: bf16[128,128], index: 5, kind: input, shape index: {}]   ;;  %s937_s6 = inlined_call_operand.vmem [shape: f32[1,128], index: 6, kind: input, shape index: {}]   ;;  %s938_s7 = inlined_call_operand.hbm [shape: bf16[128,128], index: 7, kind: input, shape index: {}]   ;;  %s939_s8 = inlined_call_operand.vmem [shape: f32[1,128], index: 8, kind: input, shape index: {}]   ;;  %s940_s9 = inlined_call_operand.hbm [shape: f32[2,128], index: 9, kind: output, shape index: {}]  }
   0x1   :  { %15 = vsyncpa [#allocation6], 0 }
   0x2   :  { %16 = vsyncpa [#allocation9], 0 }
   0x3   :  { %17 = vsyncpa [#allocation4], 0  ;;  %s799_s30 = smov [#allocation5]  }
   0x4   :  { %s34_s10 = sshll.u32 %s799_s30, 4  ;;  %s35_s10 = int_to_ptr.vmem [resolvable:$true] %s34_s10 }
   0x5   :  { %s679_s11 = scalar_lea.vmem %s35_s10, 64  ;;  %p684_p1 = scmp.lt.s32.totalorder %s35_s10, %s35_s10 }
   0x6   :  { %p680_p0 = scmp.ne.s32.totalorder %s35_s10, %s679_s11  ;;  %p685_p2 = scmp.lt.s32.totalorder %s679_s11, %s679_s11 }
   0x8   :  { %p686_p3 = por %p685_p2, %p684_p1 }
   0xa   :  { %p687_p4 = pnand %p686_p3, %p680_p0 }
   0xc   :  { %690 = shalt.err (!%p687_p4)
}
   0xd   :  { %37 = dma.hbm_to_vmem [thread:$0]  %s932_s1, 64, %s35_s10, [#allocation6]  }
   0xe   :  { %s800_s14 = smov [#allocation8]   ;;  %s801_s16 = smov [#allocation2]  }
   0xf   :  { %s59_s15 = sshll.u32 %s800_s14, 4  ;;  %s24_s17 = sshll.u32 %s801_s16, 4  ;;  %s60_s15 = int_to_ptr.vmem [resolvable:$true] %s59_s15  ;;  %s25_s17 = int_to_ptr.vmem [resolvable:$true] %s24_s17 }
  0x10   :  { %s699_s18 = scalar_lea.vmem %s60_s15, 1024  ;;  %p704_p6 = scmp.lt.s32.totalorder %s60_s15, %s60_s15 }
  0x11   :  { %p700_p5 = scmp.ne.s32.totalorder %s60_s15, %s699_s18  ;;  %p705_p7 = scmp.lt.s32.totalorder %s699_s18, %s699_s18 }
  0x13   :  { %p706_p8 = por %p705_p7, %p704_p6 }
  0x15   :  { %p707_p9 = pnand %p706_p8, %p700_p5 }
  0x17   :  { %710 = shalt.err (!%p707_p9)
}
  0x18   :  { %s802_s19 = smov 64   ;;  %s803_s20 = smov 4  }
  0x19   :  { %65 = dma.hbm_to_vmem [thread:$0]  %s936_s5, 1024, %s60_s15, [#allocation9], %s802_s19, %s802_s19, %s803_s20  }
  0x1a   :  { %s719_s1 = scalar_lea.vmem %s25_s17, 32  ;;  %p724_p11 = scmp.lt.s32.totalorder %s25_s17, %s25_s17 }
  0x1b   :  { %p720_p10 = scmp.ne.s32.totalorder %s25_s17, %s719_s1  ;;  %p725_p12 = scmp.lt.s32.totalorder %s719_s1, %s719_s1 }
  0x1d   :  { %p726_p13 = por %p725_p12, %p724_p11 }
  0x1f   :  { %p727_p0 = pnand %p726_p13, %p720_p10 }
  0x21   :  { %730 = shalt.err (!%p727_p0)
}
  0x22   :  { %27 = dma.hbm_to_vmem [thread:$0]  %s931_s0, 32, %s25_s17, [#allocation3]  }
  0x23   :  { %s804_s25 = smov [#allocation7]   ;;  %s805_s27 = smov [#allocation10]  }
  0x24   :  { %s45_s26 = sshll.u32 %s804_s25, 4  ;;  %s73_s28 = sshll.u32 %s805_s27, 4  ;;  %s46_s26 = int_to_ptr.vmem [resolvable:$true] %s45_s26  ;;  %s74_s28 = int_to_ptr.vmem [resolvable:$true] %s73_s28 }
  0x25   :  { %s739_s29 = scalar_lea.vmem %s46_s26, 1024  ;;  %p744_p2 = scmp.lt.s32.totalorder %s46_s26, %s46_s26 }
  0x26   :  { %p740_p1 = scmp.ne.s32.totalorder %s46_s26, %s739_s29  ;;  %p745_p3 = scmp.lt.s32.totalorder %s739_s29, %s739_s29 }
  0x28   :  { %p746_p4 = por %p745_p3, %p744_p2 }
  0x2a   :  { %p747_p5 = pnand %p746_p4, %p740_p1 }
  0x2c   :  { %750 = shalt.err (!%p747_p5)
}
  0x2d   :  { %51 = dma.hbm_to_vmem [thread:$0]  %s934_s3, 1024, %s46_s26, [#allocation6], %s802_s19, %s802_s19, %s803_s20  }
  0x2e   :  { %s759_s0 = scalar_lea.vmem %s74_s28, 1024  ;;  %p764_p7 = scmp.lt.s32.totalorder %s74_s28, %s74_s28 }
  0x2f   :  { %p760_p6 = scmp.ne.s32.totalorder %s74_s28, %s759_s0  ;;  %p765_p8 = scmp.lt.s32.totalorder %s759_s0, %s759_s0 }
  0x31   :  { %p766_p9 = por %p765_p8, %p764_p7 }
  0x33   :  { %p767_p10 = pnand %p766_p9, %p760_p6 }
  0x35   :  { %770 = shalt.err (!%p767_p10)
}
  0x36   :  { %79 = dma.hbm_to_vmem [thread:$0]  %s938_s7, 1024, %s74_s28, [#allocation9], %s802_s19, %s802_s19, %s803_s20  }
  0x37   :  { %791 = dma.done.wait [#allocation3], 32  }
  0x38   :  { %792 = vsyncadd [#allocation3], 4294967264 }
  0x39   :  { %793 = dma.done.wait [#allocation6], 1088  }
  0x3a   :  { %794 = vsyncadd [#allocation6], 4294966208 }
  0x3b   :  { %795 = dma.done.wait [#allocation9], 2048  }
  0x3c   :  { %796 = vsyncadd [#allocation9], 4294965248  ;;  %v806_v0 = vmov 0.0   ;;  %vm807_vm0 = vmmov 0   ;;  %vm112_vm1 = vcmask 1043456   ;;  %v647_v5 = vld [vmem:[#allocation7 + $0x38] sm:$0xff]  }
  0x3d   :  { %571 = vmatprep.subr.bf16.mxu0 %v806_v0  ;;  %573 = vmatprep.mubr.msk.bf16.mxu0 %vm807_vm0, %v806_v0  ;;  %v100_v1 = vld [vmem:[#allocation5] sm:$0xf]  ;;  %v98_v2 = vld [vmem:[#allocation2] sm:$0x3]  ;;  %vm108_vm2 = vcmask 64512   ;;  %v648_v6 = vld [vmem:[#allocation7 + $0x30] sm:$0xff]  }
  0x3e   :  { %577 = vmatprep.subr.bf16.mxu1 %v806_v0  ;;  %593 = vmatprep.mubr.msk.bf16.mxu1 %vm807_vm0, %v806_v0  ;;  %v114_v3 = vsel %vm112_vm1, %v100_v1, 0  ;;  %v99_v4 = vpack.c.bf16 %v98_v2, %v98_v2  ;;  %v649_v7 = vld [vmem:[#allocation7 + $0x28] sm:$0xff]   ;;  %v650_v8 = vld [vmem:[#allocation7 + $0x20] sm:$0xff]   ;;  %v651_v9 = vld [vmem:[#allocation7 + $0x18] sm:$0xff]   ;;  %s808_s16 = smov [#allocation11]  }
  0x3f   :  { %572 = vmatpush3.bf16.msra.mxu0 %v114_v3  ;;  %578 = vmatpush3.bf16.msra.mxu1 %v647_v5  ;;  %v652_v10 = vld [vmem:[#allocation7 + $0x10] sm:$0xff]   ;;  %v653_v11 = vld [vmem:[#allocation7 + $0x8] sm:$0xff]   ;;  %v654_v12 = vld [vmem:[#allocation7] sm:$0xff]   ;;  %s502_s17 = sshll.u32 %s808_s16, 4  ;;  %s503_s17 = int_to_ptr.vmem [resolvable:$true] %s502_s17 }
  0x40   :  { %597 = vmatprep.subr.bf16.mxu0 %v806_v0  ;;  %579 = vmatprep.subr.bf16.mxu1 %v806_v0  ;;  %v655_v13 = vld [vmem:[#allocation8 + $0x38] sm:$0xff]   ;;  %v656_v14 = vld [vmem:[#allocation8 + $0x30] sm:$0xff]   ;;  %v657_v15 = vld [vmem:[#allocation8 + $0x28] sm:$0xff]   ;;  %p776_p12 = scmp.lt.s32.totalorder %s503_s17, %s503_s17 }
  0x41   :  { %v658_v16 = vld [vmem:[#allocation8 + $0x20] sm:$0xff]   ;;  %v659_v17 = vld [vmem:[#allocation8 + $0x18] sm:$0xff]   ;;  %v660_v18 = vld [vmem:[#allocation8 + $0x10] sm:$0xff]  }
  0x42   :  { %574 = vmatmul.mubr.msk.bf16.vlgmr.msra.gmra.mxu0 %vm108_vm2, %v99_v4  ;;  %v513_v19 = vld [vmem:[%s933_s2] ss:$0 sm:$0xff]  ;;  %v661_v27 = vld [vmem:[#allocation8 + $0x8] sm:$0xff]   ;;  %v662_v28 = vld [vmem:[#allocation8] sm:$0xff]  }
  0x43   :  { %613 = vmatprep.mubr.msk.bf16.mxu0 %vm807_vm0, %v806_v0  ;;  %580 = vmatpush3.bf16.msra.mxu1 %v648_v6  ;;  %v663_v29 = vld [vmem:[#allocation10 + $0x38] sm:$0xff]   ;;  %v664_v30 = vld [vmem:[#allocation10 + $0x30] sm:$0xff]   ;;  %v665_v31 = vld [vmem:[#allocation10 + $0x28] sm:$0xff]  }
  0x44   :  { %581 = vmatprep.subr.bf16.mxu1 %v806_v0  ;;  %598 = vmatpush3.bf16.msra.mxu0 %v655_v13  ;;  %v666_v32 = vld [vmem:[#allocation10 + $0x20] sm:$0xff]   ;;  %v667_v33 = vld [vmem:[#allocation10 + $0x18] sm:$0xff]   ;;  %v668_v34 = vld [vmem:[#allocation10 + $0x10] sm:$0xff]  }
  0x45   :  { %599 = vmatprep.subr.bf16.mxu0 %v806_v0  ;;  %v515_v35 = vld [vmem:[%s935_s4] ss:$0 sm:$0xff]  ;;  %v669_v43 = vld [vmem:[#allocation10 + $0x8] sm:$0xff]   ;;  %v670_v44 = vld [vmem:[#allocation10] sm:$0xff]  }
  0x46   :  { %v524_v45 = vld [vmem:[%s937_s6] ss:$0 sm:$0xff]  ;;  %s771_s6 = scalar_lea.vmem %s503_s17, 32 }
  0x47   :  { %582 = vmatpush3.bf16.msra.mxu1 %v649_v7  ;;  %v533_v53 = vld [vmem:[%s939_s8] ss:$0 sm:$0xff]  ;;  %p772_p11 = scmp.ne.s32.totalorder %s503_s17, %s771_s6  ;;  %p777_p13 = scmp.lt.s32.totalorder %s771_s6, %s771_s6 }
  0x48   :  { %583 = vmatprep.subr.bf16.mxu1 %v806_v0  ;;  %600 = vmatpush3.bf16.msra.mxu0 %v656_v14 }
  0x49   :  { %601 = vmatprep.subr.bf16.mxu0 %v806_v0  ;;  %p778_p0 = por %p777_p13, %p776_p12 }
  0x4b   :  { %584 = vmatpush3.bf16.msra.mxu1 %v650_v8  ;;  %p779_p1 = pnand %p778_p0, %p772_p11 }
  0x4c   :  { %585 = vmatprep.subr.bf16.mxu1 %v806_v0  ;;  %602 = vmatpush3.bf16.msra.mxu0 %v657_v15 }
  0x4d   :  { %603 = vmatprep.subr.bf16.mxu0 %v806_v0 }
  0x4f   :  { %586 = vmatpush3.bf16.msra.mxu1 %v651_v9 }
  0x50   :  { %587 = vmatprep.subr.bf16.mxu1 %v806_v0  ;;  %604 = vmatpush3.bf16.msra.mxu0 %v658_v16 }
  0x51   :  { %605 = vmatprep.subr.bf16.mxu0 %v806_v0 }
  0x53   :  { %588 = vmatpush3.bf16.msra.mxu1 %v652_v10 }
  0x54   :  { %589 = vmatprep.subr.bf16.mxu1 %v806_v0  ;;  %606 = vmatpush3.bf16.msra.mxu0 %v659_v17 }
  0x55   :  { %607 = vmatprep.subr.bf16.mxu0 %v806_v0 }
  0x57   :  { %590 = vmatpush3.bf16.msra.mxu1 %v653_v11 }
  0x58   :  { %591 = vmatprep.subr.bf16.mxu1 %v806_v0  ;;  %608 = vmatpush3.bf16.msra.mxu0 %v660_v18 }
  0x59   :  { %609 = vmatprep.subr.bf16.mxu0 %v806_v0 }
  0x5b   :  { %592 = vmatpush3.bf16.msra.mxu1 %v654_v12 }
  0x5c   :  { %617 = vmatprep.subr.bf16.mxu1 %v806_v0  ;;  %610 = vmatpush3.bf16.msra.mxu0 %v661_v27 }
  0x5d   :  { %611 = vmatprep.subr.bf16.mxu0 %v806_v0 }
  0x60   :  { %612 = vmatpush3.bf16.msra.mxu0 %v662_v28 }
 0x102   :  { %v150_v20 = vpop.f32.mrf.mxu0 }
 0x103   :  { %v151_v21 = vadd.f32 %v513_v19, %v150_v20 }
 0x104   :  { %v575_v22 = vpop.f32.mrf.mxu0 }
 0x105   :  { %v156_v23 = vmax.f32 %v151_v21, 0.0 }
 0x106   :  { %v153_v24 = vpop.f32.mrf.mxu0 }
 0x107   :  { %v157_v25 = vpack.c.bf16 %v156_v23, %v156_v23 }
 0x108   :  { %v576_v26 = vpop.f32.mrf.mxu0 }
 0x109   :  { %594 = vmatmul.mubr.bf16.vlgmr.msra.gmra.mxu1 %v157_v25 }
 0x10a   :  { %633 = vmatprep.mubr.msk.bf16.mxu1 %vm807_vm0, %v806_v0  ;;  %618 = vmatpush3.bf16.msra.mxu1 %v663_v29 }
 0x10b   :  { %619 = vmatprep.subr.bf16.mxu1 %v806_v0 }
 0x10e   :  { %620 = vmatpush3.bf16.msra.mxu1 %v664_v30 }
 0x10f   :  { %621 = vmatprep.subr.bf16.mxu1 %v806_v0 }
 0x112   :  { %622 = vmatpush3.bf16.msra.mxu1 %v665_v31 }
 0x113   :  { %623 = vmatprep.subr.bf16.mxu1 %v806_v0 }
 0x116   :  { %624 = vmatpush3.bf16.msra.mxu1 %v666_v32 }
 0x117   :  { %625 = vmatprep.subr.bf16.mxu1 %v806_v0 }
 0x11a   :  { %626 = vmatpush3.bf16.msra.mxu1 %v667_v33 }
 0x11b   :  { %627 = vmatprep.subr.bf16.mxu1 %v806_v0 }
 0x11e   :  { %628 = vmatpush3.bf16.msra.mxu1 %v668_v34 }
 0x11f   :  { %629 = vmatprep.subr.bf16.mxu1 %v806_v0 }
 0x122   :  { %630 = vmatpush3.bf16.msra.mxu1 %v669_v43 }
 0x123   :  { %631 = vmatprep.subr.bf16.mxu1 %v806_v0 }
 0x126   :  { %632 = vmatpush3.bf16.msra.mxu1 %v670_v44 }
 0x1c9   :  { %v263_v36 = vpop.f32.mrf.mxu1 }
 0x1ca   :  { %v264_v37 = vadd.f32 %v515_v35, %v263_v36 }
 0x1cb   :  { %v595_v38 = vpop.f32.mrf.mxu1 }
 0x1cc   :  { %v269_v39 = vmax.f32 %v264_v37, 0.0 }
 0x1cd   :  { %v266_v40 = vpop.f32.mrf.mxu1 }
 0x1ce   :  { %v270_v41 = vpack.c.bf16 %v269_v39, %v269_v39 }
 0x1cf   :  { %v596_v42 = vpop.f32.mrf.mxu1 }
 0x1d0   :  { %614 = vmatmul.mubr.bf16.vlgmr.msra.gmra.mxu0 %v270_v41 }
 0x290   :  { %v376_v46 = vpop.f32.mrf.mxu0 }
 0x291   :  { %v377_v47 = vadd.f32 %v524_v45, %v376_v46 }
 0x292   :  { %v615_v48 = vpop.f32.mrf.mxu0 }
 0x293   :  { %v382_v49 = vmax.f32 %v377_v47, 0.0 }
 0x294   :  { %v379_v50 = vpop.f32.mrf.mxu0 }
 0x295   :  { %v383_v51 = vpack.c.bf16 %v382_v49, %v382_v49 }
 0x296   :  { %v616_v52 = vpop.f32.mrf.mxu0 }
 0x297   :  { %634 = vmatmul.mubr.bf16.vlgmr.msra.gmra.mxu1 %v383_v51 }
 0x357   :  { %v489_v54 = vpop.f32.mrf.mxu1 }
 0x358   :  { %v490_v55 = vadd.f32 %v533_v53, %v489_v54 }
 0x359   :  { %v635_v56 = vpop.f32.mrf.mxu1 }
 0x35a   :  { %495 = vst [vmem:[#allocation11] sm:$0x3] %v490_v55 }
 0x35b   :  { %v492_v57 = vpop.f32.mrf.mxu1 }
 0x35c   :  { %782 = shalt.err (!%p779_p1)
}
 0x35d   :  { %505 = dma.vmem_to_hbm [thread:$0]  %s503_s17, 32, %s940_s9, [#allocation4]   ;;  %v636_v58 = vpop.f32.mrf.mxu1 }
 0x35e   :  { %797 = dma.done.wait [#allocation4], 32  }
 0x35f   :  { %798 = vsyncadd [#allocation4], 4294967264 }
 0x360   :  { %509 = vsyncpa [#allocation3], 1 }
 0x361   :  { %510 = vsyncpa [#allocation6], 1 }
 0x362   :  { %511 = vsyncpa [#allocation9], 1 }
 0x363   :  { %512 = vsyncpa [#allocation4], 1 }

</bundles_post_ra>
